<compile_context>
chip_gen: v7x
topology: tpu7x:2x2x1
jax: 0.10.0
libtpu: 0.0.40
codegen_flags: <defaults>
</compile_context>

<pallas_src>
import functools

import jax
import jax.numpy as jnp
from jax.experimental import pallas as pl
from jax.experimental.pallas import tpu as pltpu


# ----------------------------------------------------------------------------
# Compiler params (generation-aware VMEM budget)
# ----------------------------------------------------------------------------
def _vmem_limit_bytes():
    try:
        cap = int(pltpu.get_tpu_info().vmem_capacity_bytes)
        return max(32 * 1024 * 1024, min((cap * 3) // 4, 96 * 1024 * 1024))
    except Exception:  # conservative fallback (fits v7x's 64 MiB physical VMEM)
        return 48 * 1024 * 1024


def _compiler_params():
    return pltpu.CompilerParams(
        dimension_semantics=("parallel",),
        vmem_limit_bytes=_vmem_limit_bytes(),
    )


def _softplus(x):
    # matches torch.nn.functional.softplus (beta=1, threshold=20), in f32
    return jnp.where(x > 20.0, x, jnp.log1p(jnp.exp(jnp.minimum(x, 20.0))))


def _full_spec(a):
    """Full-extent (resident across the 1-D grid) BlockSpec for a weight array."""
    return pl.BlockSpec(a.shape, lambda i, _nd=a.ndim: (0,) * _nd)


# ----------------------------------------------------------------------------
# In-kernel building blocks
# ----------------------------------------------------------------------------
def _latent_chain(x_bf16, w_in, b_in, w_hid_ref, b_hid_ref, n_hidden,
                  w_mu, b_mu, w_sig, b_sig):
    """LatentLayer chain on a channel-first slab x: [C_in, X] bf16 -> (mu, var) f32 [L, X]."""
    h = jnp.maximum(
        jnp.dot(w_in, x_bf16, preferred_element_type=jnp.float32) + b_in, 0.0)
    for l in range(n_hidden):                                   # static unroll
        h = jnp.maximum(
            jnp.dot(w_hid_ref[l], h.astype(jnp.bfloat16),
                    preferred_element_type=jnp.float32) + b_hid_ref[l], 0.0)
    hb = h.astype(jnp.bfloat16)
    # two separate heads (sublane-tile friendly; no [2L] split slicing)
    mu = jnp.dot(w_mu, hb, preferred_element_type=jnp.float32) + b_mu
    sig_pre = jnp.dot(w_sig, hb, preferred_element_type=jnp.float32) + b_sig
    sigma = 0.1 + 0.9 * _softplus(sig_pre)
    return mu, sigma * sigma


def _aggregate_sample_store(mu_all, var_all, adj_ref, mic_ref, eps_ref,
                            mu_u_ref, std_u_ref, z_u_ref, num_m, num_n, t_len):
    """Gaussian-product aggregation + rsample + user-layout stores for one batch element.

    mu_all / var_all : [L, (num_m + num_n)*t]  -- target node slabs first, then context nodes.
    adj_ref: (1, num_m, num_n)   mic_ref: (1, num_n, t)   eps_ref: (1, num_m, L, t)
    outputs: (1, num_m, L, t) f32.
    """
    L = mu_u_ref.shape[2]
    Xt = num_m * t_len
    adj_v = adj_ref[0]                                         # [m, n]
    keep = 1.0 - mic_ref[0]                                    # [n, t]
    # context precomputation, vectorised over all context nodes (approx recip on the EUP slot)
    inv_vc = pl.reciprocal(var_all[:, Xt:], approx=True)       # [L, n*t]
    rcinv = mu_all[:, Xt:] * inv_vc                            # [L, n*t]

    for a in range(num_m):                                     # static unroll over target nodes
        adj_row = adj_v[a:a + 1, :]                            # [1, n]
        # pass 1: masked adjacency + denominator (no [n,m,t] materialisation)
        masked = []
        denom = jnp.ones((1, t_len), jnp.float32)
        for j in range(num_n):
            mj = adj_row[:, j:j + 1] * keep[j:j + 1, :]        # [1, t]
            masked.append(mj)
            denom = denom + mj
        inv_den = pl.reciprocal(denom, approx=True)            # [1, t]
        # pass 2: squared normalised weights recomputed on the fly
        s1 = jnp.zeros((L, t_len), jnp.float32)
        s2 = jnp.zeros((L, t_len), jnp.float32)
        for j in range(num_n):
            w = masked[j] * inv_den
            w = w * w                                          # [1, t]
            s1 = s1 + w * inv_vc[:, j * t_len:(j + 1) * t_len]
            s2 = s2 + w * rcinv[:, j * t_len:(j + 1) * t_len]
        mu_t_a = mu_all[:, a * t_len:(a + 1) * t_len]          # [L, t]
        inv_vt = 1.0 / var_all[:, a * t_len:(a + 1) * t_len]   # exact: feeds returned variance
        var_agg = 1.0 / (inv_vt + s1)                          # exact final reciprocal
        mu_agg = var_agg * (mu_t_a * inv_vt + s2)
        std = jnp.sqrt(var_agg)
        z = mu_agg + std * eps_ref[0, a]                       # rsample fused (eps from wrapper)
        # user-facing layout [m, L, t] stored directly (lane axis = time unchanged)
        mu_u_ref[0, a] = mu_agg
        std_u_ref[0, a] = std
        z_u_ref[0, a] = z


# ----------------------------------------------------------------------------
# Fused per-level kernels
# ----------------------------------------------------------------------------
def fused_top_kernel(x_ref, adj_ref, mic_ref, eps_ref,
                     w_in_ref, b_in_ref, w_hid_ref, b_hid_ref,
                     w_mu_ref, b_mu_ref, w_sig_ref, b_sig_ref,
                     mu_u_ref, std_u_ref, z_u_ref,
                     *, n_hidden, num_m, num_n, t_len):
    """Top level: one shared-weight chain on the concatenated [target|context] slab + aggregation."""
    mu_all, var_all = _latent_chain(
        x_ref[0], w_in_ref[...], b_in_ref[...], w_hid_ref, b_hid_ref, n_hidden,
        w_mu_ref[...], b_mu_ref[...], w_sig_ref[...], b_sig_ref[...])
    _aggregate_sample_store(mu_all, var_all, adj_ref, mic_ref, eps_ref,
                            mu_u_ref, std_u_ref, z_u_ref, num_m, num_n, t_len)


def fused_z_kernel(z_ref, dt_ref, dc_ref, adj_ref, mic_ref, eps_ref,
                   wz_ref, bz_ref,
                   w_in_ref, b_in_ref, w_hid_ref, b_hid_ref,
                   w_mu_ref, b_mu_ref, w_sig_ref, b_sig_ref,
                   mu_u_ref, std_u_ref, z_u_ref,
                   *, n_hidden, num_m, num_n, t_len):
    """Lower levels: z-conv + f32 residual add + single chain on [target|context] + aggregation."""
    # rebuild channel-first z slab [Lz, m*t] from the previous level's user-layout sample
    z_cf = jnp.concatenate(
        [z_ref[0, a].astype(jnp.bfloat16) for a in range(num_m)], axis=1)
    z_next = jnp.maximum(
        jnp.dot(wz_ref[...], z_cf, preferred_element_type=jnp.float32) + bz_ref[...], 0.0)
    xt = (dt_ref[0] + z_next).astype(jnp.bfloat16)             # residual add in f32, then bf16
    slab = jnp.concatenate([xt, dc_ref[0]], axis=1)            # [C, (m+n)*t] bf16
    mu_all, var_all = _latent_chain(
        slab, w_in_ref[...], b_in_ref[...], w_hid_ref, b_hid_ref, n_hidden,
        w_mu_ref[...], b_mu_ref[...], w_sig_ref[...], b_sig_ref[...])
    _aggregate_sample_store(mu_all, var_all, adj_ref, mic_ref, eps_ref,
                            mu_u_ref, std_u_ref, z_u_ref, num_m, num_n, t_len)


# ----------------------------------------------------------------------------
# pallas_call wrappers
# ----------------------------------------------------------------------------
def fused_level_top(x_slab, adj, mic, eps, p, num_m, num_n, t_len):
    """x_slab: [b, C, (m+n)*t] bf16 -> (mu, std, z) each [b, m, L, t] f32."""
    b, C, X = x_slab.shape
    L = p["w_mu"].shape[0]
    kernel = functools.partial(fused_top_kernel, n_hidden=p["n_hidden"],
                               num_m=num_m, num_n=num_n, t_len=t_len)
    u_spec = pl.BlockSpec((1, num_m, L, t_len), lambda i: (i, 0, 0, 0))
    u_shape = jax.ShapeDtypeStruct((b, num_m, L, t_len), jnp.float32)
    return pl.pallas_call(
        kernel,
        grid=(b,),
        in_specs=[pl.BlockSpec((1, C, X), lambda i: (i, 0, 0)),
                  pl.BlockSpec((1, num_m, num_n), lambda i: (i, 0, 0)),
                  pl.BlockSpec((1, num_n, t_len), lambda i: (i, 0, 0)),
                  u_spec,
                  _full_spec(p["w_in"]), _full_spec(p["b_in"]),
                  _full_spec(p["w_hid"]), _full_spec(p["b_hid"]),
                  _full_spec(p["w_mu"]), _full_spec(p["b_mu"]),
                  _full_spec(p["w_sig"]), _full_spec(p["b_sig"])],
        out_specs=(u_spec, u_spec, u_spec),
        out_shape=(u_shape, u_shape, u_shape),
        compiler_params=_compiler_params(),
    )(x_slab, adj, mic, eps, p["w_in"], p["b_in"], p["w_hid"], p["b_hid"],
      p["w_mu"], p["b_mu"], p["w_sig"], p["b_sig"])


def fused_level_z(z_prev, dt_cf, dc_cf, adj, mic, eps, p_lat, p, num_m, num_n, t_len):
    """z_prev: [b,m,Lz,t] f32; dt_cf: [b,C,m*t] f32; dc_cf: [b,C,n*t] bf16."""
    b, C, Xt = dt_cf.shape
    Xc = dc_cf.shape[2]
    Lz = z_prev.shape[2]
    L = p["w_mu"].shape[0]
    kernel = functools.partial(fused_z_kernel, n_hidden=p["n_hidden"],
                               num_m=num_m, num_n=num_n, t_len=t_len)
    u_spec = pl.BlockSpec((1, num_m, L, t_len), lambda i: (i, 0, 0, 0))
    u_shape = jax.ShapeDtypeStruct((b, num_m, L, t_len), jnp.float32)
    return pl.pallas_call(
        kernel,
        grid=(b,),
        in_specs=[pl.BlockSpec((1, num_m, Lz, t_len), lambda i: (i, 0, 0, 0)),
                  pl.BlockSpec((1, C, Xt), lambda i: (i, 0, 0)),
                  pl.BlockSpec((1, C, Xc), lambda i: (i, 0, 0)),
                  pl.BlockSpec((1, num_m, num_n), lambda i: (i, 0, 0)),
                  pl.BlockSpec((1, num_n, t_len), lambda i: (i, 0, 0)),
                  u_spec,
                  _full_spec(p_lat["w"]), _full_spec(p_lat["b"]),
                  _full_spec(p["w_in"]), _full_spec(p["b_in"]),
                  _full_spec(p["w_hid"]), _full_spec(p["b_hid"]),
                  _full_spec(p["w_mu"]), _full_spec(p["b_mu"]),
                  _full_spec(p["w_sig"]), _full_spec(p["b_sig"])],
        out_specs=(u_spec, u_spec, u_spec),
        out_shape=(u_shape, u_shape, u_shape),
        compiler_params=_compiler_params(),
    )(z_prev, dt_cf, dc_cf, adj, mic, eps, p_lat["w"], p_lat["b"],
      p["w_in"], p["b_in"], p["w_hid"], p["b_hid"],
      p["w_mu"], p["b_mu"], p["w_sig"], p["b_sig"])


# ----------------------------------------------------------------------------
# Parameter init (deterministic, synthetic) & full forward
# ----------------------------------------------------------------------------
def init_params(key, tcn_channels, latent_channels, num_hidden_layers):
    keys = iter(jax.random.split(key, 1024))

    def dense(cin, cout, scale=0.3):
        # channel-first conv1x1: y = W @ x + b,  W: [C_out, C_in], b: [C_out, 1]
        w = jax.random.normal(next(keys), (cout, cin), jnp.float32) * scale
        b = jax.random.normal(next(keys), (cout, 1), jnp.float32) * scale
        return w, b

    layers_c = []
    for i in range(len(tcn_channels)):
        tcn, lat = tcn_channels[i], latent_channels[i]
        w_in, b_in = dense(tcn, lat)                     # latent_dim_in == 0
        hw, hb = [], []
        for _ in range(max(num_hidden_layers, 1)):       # pad so stacking works for nh == 0
            w, bb = dense(lat, lat)
            hw.append(w)
            hb.append(bb)
        w_mu, b_mu = dense(lat, lat)                     # enc_out_1
        w_sig, b_sig = dense(lat, lat)                   # enc_out_2
        layers_c.append(dict(
            w_in=w_in, b_in=b_in,
            w_hid=jnp.stack(hw), b_hid=jnp.stack(hb),
            n_hidden=num_hidden_layers,
            w_mu=w_mu, b_mu=b_mu, w_sig=w_sig, b_sig=b_sig))

    latent_layer = []
    for i in range(1, len(tcn_channels)):
        w, b = dense(latent_channels[i], tcn_channels[i - 1])
        latent_layer.append(dict(w=w, b=b))

    return dict(layers_c=layers_c, latent_layer=latent_layer)


def _to_channel_first(x, dtype):
    """[b, N, C, t] -> [b, C, N*t] in the requested dtype (done once per raw input)."""
    b, n, c, t = x.shape
    return jnp.transpose(x, (0, 2, 1, 3)).reshape(b, c, n * t).astype(dtype)


def _bf16_layer(p):
    q = dict(p)
    for k in ("w_in", "w_hid", "w_mu", "w_sig"):
        q[k] = p[k].astype(jnp.bfloat16)
    return q


def inference_model_forward(params, d_c, d_t, adj, missing_index_context, key,
                            training=True):
    b, num_m, num_n = adj.shape
    t = d_c[0].shape[-1]
    n_levels = len(params["layers_c"])
    top = n_levels - 1

    # one-time layout conversions (no per-level transposes afterwards)
    adj_f = adj.astype(jnp.float32)                                               # [b, m, n]
    mic_nt = jnp.transpose(missing_index_context.astype(jnp.float32), (0, 2, 1))  # [b, n, t]

    # top level: single bf16 slab, target nodes first then context nodes
    top_slab = jnp.concatenate(
        [_to_channel_first(d_t[top], jnp.bfloat16),
         _to_channel_first(d_c[top], jnp.bfloat16)], axis=2)
    # lower levels: target slab kept f32 (f32 residual add with z_next), context slab bf16
    dt_cf = [_to_channel_first(d_t[i], jnp.float32) for i in range(n_levels - 1)]
    dc_cf = [_to_channel_first(d_c[i], jnp.bfloat16) for i in range(n_levels - 1)]

    layers_bf = [_bf16_layer(p) for p in params["layers_c"]]
    latlat_bf = [dict(w=p["w"].astype(jnp.bfloat16), b=p["b"])
                 for p in params["latent_layer"]]

    def eps_for(latent_dim, k):
        if training:
            return jax.random.normal(k, (b, num_m, latent_dim, t), jnp.float32)
        return jnp.zeros((b, num_m, latent_dim, t), jnp.float32)

    z_list, dists = [], []
    z_prev = None
    for level_idx in [top] + list(reversed(range(n_levels - 1))):
        p = layers_bf[level_idx]
        L = p["w_mu"].shape[0]
        key, sub = jax.random.split(key)
        eps = eps_for(L, sub)
        if z_prev is None:
            mu_u, std_u, z_u = fused_level_top(top_slab, adj_f, mic_nt, eps, p,
                                               num_m, num_n, t)
        else:
            mu_u, std_u, z_u = fused_level_z(z_prev, dt_cf[level_idx], dc_cf[level_idx],
                                             adj_f, mic_nt, eps,
                                             latlat_bf[level_idx], p,
                                             num_m, num_n, t)
        # Normal(mu, std) returned as a (mean, stddev) tuple, already in [b, m, L, t]
        dists.append((mu_u, std_u))
        z_list.append(z_u)
        z_prev = z_u

    return z_list, dists


# ----------------------------------------------------------------------------
if __name__ == "__main__":
    tcn_channels = [8, 16]
    latent_channels = [4, 8]
    num_hidden_layers = 1

    b, num_m, num_n, t = 2, 2, 3, 8

    root = jax.random.PRNGKey(0)
    (k_par, k_dc0, k_dc1, k_dt0, k_dt1,
     k_adj, k_mic, k_sample) = jax.random.split(root, 8)

    params = init_params(k_par, tcn_channels, latent_channels, num_hidden_layers)

    d_c = [jax.random.normal(k_dc0, (b, num_n, tcn_channels[0], t), jnp.float32),
           jax.random.normal(k_dc1, (b, num_n, tcn_channels[1], t), jnp.float32)]
    d_t = [jax.random.normal(k_dt0, (b, num_m, tcn_channels[0], t), jnp.float32),
           jax.random.normal(k_dt1, (b, num_m, tcn_channels[1], t), jnp.float32)]
    adj = jax.random.bernoulli(k_adj, 0.7, (b, num_m, num_n)).astype(jnp.float32)
    missing_index_context = jax.random.bernoulli(
        k_mic, 0.2, (b, t, num_n)).astype(jnp.float32)

    z, dists = inference_model_forward(params, d_c, d_t, adj,
                                       missing_index_context, k_sample,
                                       training=True)
    jax.block_until_ready((z, dists))

    assert z[0].shape == (b, num_m, latent_channels[1], t)
    assert z[1].shape == (b, num_m, latent_channels[0], t)
    assert all(bool(jnp.all(jnp.isfinite(x))) for x in z)
    assert all(bool(jnp.all(jnp.isfinite(m)) and jnp.all(jnp.isfinite(s)))
               for m, s in dists)

    print("KERNEL_OK")
</pallas_src>

<mosaic_0001>
module attributes {stable_mosaic.version = 11 : i64} {
  func.func @fused_top_kernel(%arg0: i32, %arg1: memref<1x16x40xbf16, #tpu.memory_space<vmem>>, %arg2: memref<1x2x3xf32, #tpu.memory_space<vmem>>, %arg3: memref<1x3x8xf32, #tpu.memory_space<vmem>>, %arg4: memref<1x2x8x8xf32, #tpu.memory_space<vmem>>, %arg5: memref<8x16xbf16, #tpu.memory_space<vmem>>, %arg6: memref<8x1xf32, #tpu.memory_space<vmem>>, %arg7: memref<1x8x8xbf16, #tpu.memory_space<vmem>>, %arg8: memref<1x8x1xf32, #tpu.memory_space<vmem>>, %arg9: memref<8x8xbf16, #tpu.memory_space<vmem>>, %arg10: memref<8x1xf32, #tpu.memory_space<vmem>>, %arg11: memref<8x8xbf16, #tpu.memory_space<vmem>>, %arg12: memref<8x1xf32, #tpu.memory_space<vmem>>, %arg13: memref<1x2x8x8xf32, #tpu.memory_space<vmem>>, %arg14: memref<1x2x8x8xf32, #tpu.memory_space<vmem>>, %arg15: memref<1x2x8x8xf32, #tpu.memory_space<vmem>>) attributes {dimension_semantics = [#tpu.dimension_semantics<parallel>], iteration_bounds = array<i64: 2>, scalar_prefetch = 0 : i64, scratch_operands = 0 : i64, tpu.core_type = #tpu.core_type<tc>, window_params = [{transform_indices = @transform_0, window_bounds = array<i64: 1, 16, 40>}, {transform_indices = @transform_1, window_bounds = array<i64: 1, 2, 3>}, {transform_indices = @transform_2, window_bounds = array<i64: 1, 3, 8>}, {transform_indices = @transform_3, window_bounds = array<i64: 1, 2, 8, 8>}, {pipeline_mode = #tpu.pipeline_mode<synchronous>, transform_indices = @transform_4, window_bounds = array<i64: 8, 16>}, {pipeline_mode = #tpu.pipeline_mode<synchronous>, transform_indices = @transform_5, window_bounds = array<i64: 8, 1>}, {pipeline_mode = #tpu.pipeline_mode<synchronous>, transform_indices = @transform_6, window_bounds = array<i64: 1, 8, 8>}, {pipeline_mode = #tpu.pipeline_mode<synchronous>, transform_indices = @transform_7, window_bounds = array<i64: 1, 8, 1>}, {pipeline_mode = #tpu.pipeline_mode<synchronous>, transform_indices = @transform_8, window_bounds = array<i64: 8, 8>}, {pipeline_mode = #tpu.pipeline_mode<synchronous>, transform_indices = @transform_9, window_bounds = array<i64: 8, 1>}, {pipeline_mode = #tpu.pipeline_mode<synchronous>, transform_indices = @transform_10, window_bounds = array<i64: 8, 8>}, {pipeline_mode = #tpu.pipeline_mode<synchronous>, transform_indices = @transform_11, window_bounds = array<i64: 8, 1>}, {transform_indices = @transform_12, window_bounds = array<i64: 1, 2, 8, 8>}, {transform_indices = @transform_13, window_bounds = array<i64: 1, 2, 8, 8>}, {transform_indices = @transform_14, window_bounds = array<i64: 1, 2, 8, 8>}]} {
    %c0 = arith.constant 0 : index
    %c0_0 = arith.constant 0 : index
    %c0_1 = arith.constant 0 : index
    %0 = vector.load %arg1[%c0, %c0_0, %c0_1] : memref<1x16x40xbf16, #tpu.memory_space<vmem>>, vector<1x16x40xbf16>
    %1 = vector.shape_cast %0 : vector<1x16x40xbf16> to vector<16x40xbf16>
    %c0_2 = arith.constant 0 : index
    %c0_3 = arith.constant 0 : index
    %2 = vector.load %arg5[%c0_2, %c0_3] : memref<8x16xbf16, #tpu.memory_space<vmem>>, vector<8x16xbf16>
    %c0_4 = arith.constant 0 : index
    %c0_5 = arith.constant 0 : index
    %3 = vector.load %arg6[%c0_4, %c0_5] : memref<8x1xf32, #tpu.memory_space<vmem>>, vector<8x1xf32>
    %c0_6 = arith.constant 0 : index
    %c0_7 = arith.constant 0 : index
    %4 = vector.load %arg9[%c0_6, %c0_7] : memref<8x8xbf16, #tpu.memory_space<vmem>>, vector<8x8xbf16>
    %c0_8 = arith.constant 0 : index
    %c0_9 = arith.constant 0 : index
    %5 = vector.load %arg10[%c0_8, %c0_9] : memref<8x1xf32, #tpu.memory_space<vmem>>, vector<8x1xf32>
    %c0_10 = arith.constant 0 : index
    %c0_11 = arith.constant 0 : index
    %6 = vector.load %arg11[%c0_10, %c0_11] : memref<8x8xbf16, #tpu.memory_space<vmem>>, vector<8x8xbf16>
    %c0_12 = arith.constant 0 : index
    %c0_13 = arith.constant 0 : index
    %7 = vector.load %arg12[%c0_12, %c0_13] : memref<8x1xf32, #tpu.memory_space<vmem>>, vector<8x1xf32>
    %cst = arith.constant dense<0.000000e+00> : vector<8x40xf32>
    %8 = tpu.matmul %2, %1, %cst {dimension_numbers = #tpu.dot_dimension_numbers<[1], [0], [0], [1], [0, 0, 1, 1], [], []>} : vector<8x16xbf16>, vector<16x40xbf16>, vector<8x40xf32> -> vector<8x40xf32>
    %9 = vector.broadcast %3 : vector<8x1xf32> to vector<8x40xf32>
    %10 = arith.addf %8, %9 : vector<8x40xf32>
    %cst_14 = arith.constant 0.000000e+00 : f32
    %11 = vector.broadcast %cst_14 : f32 to vector<8x40xf32>
    %12 = arith.maximumf %10, %11 : vector<8x40xf32>
    %c0_15 = arith.constant 0 : index
    %c0_16 = arith.constant 0 : index
    %c0_17 = arith.constant 0 : index
    %13 = vector.load %arg7[%c0_15, %c0_16, %c0_17] : memref<1x8x8xbf16, #tpu.memory_space<vmem>>, vector<1x8x8xbf16>
    %14 = vector.shape_cast %13 : vector<1x8x8xbf16> to vector<8x8xbf16>
    %15 = arith.truncf %12 : vector<8x40xf32> to vector<8x40xbf16>
    %cst_18 = arith.constant dense<0.000000e+00> : vector<8x40xf32>
    %16 = tpu.matmul %14, %15, %cst_18 {dimension_numbers = #tpu.dot_dimension_numbers<[1], [0], [0], [1], [0, 0, 1, 1], [], []>} : vector<8x8xbf16>, vector<8x40xbf16>, vector<8x40xf32> -> vector<8x40xf32>
    %c0_19 = arith.constant 0 : index
    %c0_20 = arith.constant 0 : index
    %c0_21 = arith.constant 0 : index
    %17 = vector.load %arg8[%c0_19, %c0_20, %c0_21] : memref<1x8x1xf32, #tpu.memory_space<vmem>>, vector<1x8x1xf32>
    %18 = vector.shape_cast %17 : vector<1x8x1xf32> to vector<8x1xf32>
    %19 = vector.broadcast %18 : vector<8x1xf32> to vector<8x40xf32>
    %20 = arith.addf %16, %19 : vector<8x40xf32>
    %cst_22 = arith.constant 0.000000e+00 : f32
    %21 = vector.broadcast %cst_22 : f32 to vector<8x40xf32>
    %22 = arith.maximumf %20, %21 : vector<8x40xf32>
    %23 = arith.truncf %22 : vector<8x40xf32> to vector<8x40xbf16>
    %cst_23 = arith.constant dense<0.000000e+00> : vector<8x40xf32>
    %24 = tpu.matmul %4, %23, %cst_23 {dimension_numbers = #tpu.dot_dimension_numbers<[1], [0], [0], [1], [0, 0, 1, 1], [], []>} : vector<8x8xbf16>, vector<8x40xbf16>, vector<8x40xf32> -> vector<8x40xf32>
    %25 = vector.broadcast %5 : vector<8x1xf32> to vector<8x40xf32>
    %26 = arith.addf %24, %25 : vector<8x40xf32>
    %cst_24 = arith.constant dense<0.000000e+00> : vector<8x40xf32>
    %27 = tpu.matmul %6, %23, %cst_24 {dimension_numbers = #tpu.dot_dimension_numbers<[1], [0], [0], [1], [0, 0, 1, 1], [], []>} : vector<8x8xbf16>, vector<8x40xbf16>, vector<8x40xf32> -> vector<8x40xf32>
    %28 = vector.broadcast %7 : vector<8x1xf32> to vector<8x40xf32>
    %29 = arith.addf %27, %28 : vector<8x40xf32>
    %cst_25 = arith.constant 2.000000e+01 : f32
    %30 = vector.broadcast %cst_25 : f32 to vector<8x40xf32>
    %31 = arith.cmpf ogt, %29, %30 : vector<8x40xf32>
    %cst_26 = arith.constant 2.000000e+01 : f32
    %32 = vector.broadcast %cst_26 : f32 to vector<8x40xf32>
    %33 = arith.minimumf %29, %32 : vector<8x40xf32>
    %34 = math.exp %33 : vector<8x40xf32>
    %35 = math.log1p %34 : vector<8x40xf32>
    %36 = arith.select %31, %29, %35 : vector<8x40xi1>, vector<8x40xf32>
    %cst_27 = arith.constant 0.899999976 : f32
    %37 = vector.broadcast %cst_27 : f32 to vector<8x40xf32>
    %38 = arith.mulf %37, %36 : vector<8x40xf32>
    %cst_28 = arith.constant 1.000000e-01 : f32
    %39 = vector.broadcast %cst_28 : f32 to vector<8x40xf32>
    %40 = arith.addf %39, %38 : vector<8x40xf32>
    %41 = arith.mulf %40, %40 : vector<8x40xf32>
    %c0_29 = arith.constant 0 : index
    %c0_30 = arith.constant 0 : index
    %c0_31 = arith.constant 0 : index
    %42 = vector.load %arg2[%c0_29, %c0_30, %c0_31] : memref<1x2x3xf32, #tpu.memory_space<vmem>>, vector<1x2x3xf32>
    %43 = vector.shape_cast %42 : vector<1x2x3xf32> to vector<2x3xf32>
    %c0_32 = arith.constant 0 : index
    %c0_33 = arith.constant 0 : index
    %c0_34 = arith.constant 0 : index
    %44 = vector.load %arg3[%c0_32, %c0_33, %c0_34] : memref<1x3x8xf32, #tpu.memory_space<vmem>>, vector<1x3x8xf32>
    %45 = vector.shape_cast %44 : vector<1x3x8xf32> to vector<3x8xf32>
    %cst_35 = arith.constant 1.000000e+00 : f32
    %46 = vector.broadcast %cst_35 : f32 to vector<3x8xf32>
    %47 = arith.subf %46, %45 : vector<3x8xf32>
    %48 = vector.extract_strided_slice %41 {offsets = [0, 16], sizes = [8, 24], strides = [1, 1]} : vector<8x40xf32> to vector<8x24xf32>
    %49 = tpu.reciprocal %48 {approx = true} : vector<8x24xf32> -> vector<8x24xf32>
    %50 = vector.extract_strided_slice %26 {offsets = [0, 16], sizes = [8, 24], strides = [1, 1]} : vector<8x40xf32> to vector<8x24xf32>
    %51 = arith.mulf %50, %49 : vector<8x24xf32>
    %52 = vector.extract_strided_slice %43 {offsets = [0, 0], sizes = [1, 3], strides = [1, 1]} : vector<2x3xf32> to vector<1x3xf32>
    %cst_36 = arith.constant 1.000000e+00 : f32
    %53 = vector.broadcast %cst_36 : f32 to vector<1x8xf32>
    %54 = vector.extract_strided_slice %52 {offsets = [0, 0], sizes = [1, 1], strides = [1, 1]} : vector<1x3xf32> to vector<1x1xf32>
    %55 = vector.extract_strided_slice %47 {offsets = [0, 0], sizes = [1, 8], strides = [1, 1]} : vector<3x8xf32> to vector<1x8xf32>
    %56 = vector.broadcast %54 : vector<1x1xf32> to vector<1x8xf32>
    %57 = arith.mulf %56, %55 : vector<1x8xf32>
    %58 = arith.addf %53, %57 : vector<1x8xf32>
    %59 = vector.extract_strided_slice %52 {offsets = [0, 1], sizes = [1, 1], strides = [1, 1]} : vector<1x3xf32> to vector<1x1xf32>
    %60 = vector.extract_strided_slice %47 {offsets = [1, 0], sizes = [1, 8], strides = [1, 1]} : vector<3x8xf32> to vector<1x8xf32>
    %61 = vector.broadcast %59 : vector<1x1xf32> to vector<1x8xf32>
    %62 = arith.mulf %61, %60 : vector<1x8xf32>
    %63 = arith.addf %58, %62 : vector<1x8xf32>
    %64 = vector.extract_strided_slice %52 {offsets = [0, 2], sizes = [1, 1], strides = [1, 1]} : vector<1x3xf32> to vector<1x1xf32>
    %65 = vector.extract_strided_slice %47 {offsets = [2, 0], sizes = [1, 8], strides = [1, 1]} : vector<3x8xf32> to vector<1x8xf32>
    %66 = vector.broadcast %64 : vector<1x1xf32> to vector<1x8xf32>
    %67 = arith.mulf %66, %65 : vector<1x8xf32>
    %68 = arith.addf %63, %67 : vector<1x8xf32>
    %69 = tpu.reciprocal %68 {approx = true} : vector<1x8xf32> -> vector<1x8xf32>
    %cst_37 = arith.constant 0.000000e+00 : f32
    %70 = vector.broadcast %cst_37 : f32 to vector<8x8xf32>
    %cst_38 = arith.constant 0.000000e+00 : f32
    %71 = vector.broadcast %cst_38 : f32 to vector<8x8xf32>
    %72 = arith.mulf %57, %69 : vector<1x8xf32>
    %73 = arith.mulf %72, %72 : vector<1x8xf32>
    %74 = vector.extract_strided_slice %49 {offsets = [0, 0], sizes = [8, 8], strides = [1, 1]} : vector<8x24xf32> to vector<8x8xf32>
    %75 = vector.broadcast %73 : vector<1x8xf32> to vector<8x8xf32>
    %76 = arith.mulf %75, %74 : vector<8x8xf32>
    %77 = arith.addf %70, %76 : vector<8x8xf32>
    %78 = vector.extract_strided_slice %51 {offsets = [0, 0], sizes = [8, 8], strides = [1, 1]} : vector<8x24xf32> to vector<8x8xf32>
    %79 = vector.broadcast %73 : vector<1x8xf32> to vector<8x8xf32>
    %80 = arith.mulf %79, %78 : vector<8x8xf32>
    %81 = arith.addf %71, %80 : vector<8x8xf32>
    %82 = arith.mulf %62, %69 : vector<1x8xf32>
    %83 = arith.mulf %82, %82 : vector<1x8xf32>
    %84 = vector.extract_strided_slice %49 {offsets = [0, 8], sizes = [8, 8], strides = [1, 1]} : vector<8x24xf32> to vector<8x8xf32>
    %85 = vector.broadcast %83 : vector<1x8xf32> to vector<8x8xf32>
    %86 = arith.mulf %85, %84 : vector<8x8xf32>
    %87 = arith.addf %77, %86 : vector<8x8xf32>
    %88 = vector.extract_strided_slice %51 {offsets = [0, 8], sizes = [8, 8], strides = [1, 1]} : vector<8x24xf32> to vector<8x8xf32>
    %89 = vector.broadcast %83 : vector<1x8xf32> to vector<8x8xf32>
    %90 = arith.mulf %89, %88 : vector<8x8xf32>
    %91 = arith.addf %81, %90 : vector<8x8xf32>
    %92 = arith.mulf %67, %69 : vector<1x8xf32>
    %93 = arith.mulf %92, %92 : vector<1x8xf32>
    %94 = vector.extract_strided_slice %49 {offsets = [0, 16], sizes = [8, 8], strides = [1, 1]} : vector<8x24xf32> to vector<8x8xf32>
    %95 = vector.broadcast %93 : vector<1x8xf32> to vector<8x8xf32>
    %96 = arith.mulf %95, %94 : vector<8x8xf32>
    %97 = arith.addf %87, %96 : vector<8x8xf32>
    %98 = vector.extract_strided_slice %51 {offsets = [0, 16], sizes = [8, 8], strides = [1, 1]} : vector<8x24xf32> to vector<8x8xf32>
    %99 = vector.broadcast %93 : vector<1x8xf32> to vector<8x8xf32>
    %100 = arith.mulf %99, %98 : vector<8x8xf32>
    %101 = arith.addf %91, %100 : vector<8x8xf32>
    %102 = vector.extract_strided_slice %26 {offsets = [0, 0], sizes = [8, 8], strides = [1, 1]} : vector<8x40xf32> to vector<8x8xf32>
    %103 = vector.extract_strided_slice %41 {offsets = [0, 0], sizes = [8, 8], strides = [1, 1]} : vector<8x40xf32> to vector<8x8xf32>
    %cst_39 = arith.constant 1.000000e+00 : f32
    %104 = vector.broadcast %cst_39 : f32 to vector<8x8xf32>
    %105 = arith.divf %104, %103 : vector<8x8xf32>
    %106 = arith.addf %105, %97 : vector<8x8xf32>
    %cst_40 = arith.constant 1.000000e+00 : f32
    %107 = vector.broadcast %cst_40 : f32 to vector<8x8xf32>
    %108 = arith.divf %107, %106 : vector<8x8xf32>
    %109 = arith.mulf %102, %105 : vector<8x8xf32>
    %110 = arith.addf %109, %101 : vector<8x8xf32>
    %111 = arith.mulf %108, %110 : vector<8x8xf32>
    %112 = math.sqrt %108 : vector<8x8xf32>
    %c0_41 = arith.constant 0 : index
    %c0_42 = arith.constant 0 : index
    %c0_43 = arith.constant 0 : index
    %c0_44 = arith.constant 0 : index
    %113 = vector.load %arg4[%c0_41, %c0_42, %c0_43, %c0_44] : memref<1x2x8x8xf32, #tpu.memory_space<vmem>>, vector<1x1x8x8xf32>
    %114 = vector.shape_cast %113 : vector<1x1x8x8xf32> to vector<8x8xf32>
    %115 = arith.mulf %112, %114 : vector<8x8xf32>
    %116 = arith.addf %111, %115 : vector<8x8xf32>
    %c0_45 = arith.constant 0 : index
    %c0_46 = arith.constant 0 : index
    %c0_47 = arith.constant 0 : index
    %c0_48 = arith.constant 0 : index
    %117 = vector.load %arg13[%c0_45, %c0_46, %c0_47, %c0_48] : memref<1x2x8x8xf32, #tpu.memory_space<vmem>>, vector<1x1x8x8xf32>
    %118 = vector.shape_cast %117 : vector<1x1x8x8xf32> to vector<8x8xf32>
    %119 = vector.shape_cast %111 : vector<8x8xf32> to vector<1x1x8x8xf32>
    tpu.vector_store %arg13[%c0_45, %c0_46, %c0_47, %c0_48], %119 {strides = array<i32>} : memref<1x2x8x8xf32, #tpu.memory_space<vmem>>, vector<1x1x8x8xf32>,
    %c0_49 = arith.constant 0 : index
    %c0_50 = arith.constant 0 : index
    %c0_51 = arith.constant 0 : index
    %c0_52 = arith.constant 0 : index
    %120 = vector.load %arg14[%c0_49, %c0_50, %c0_51, %c0_52] : memref<1x2x8x8xf32, #tpu.memory_space<vmem>>, vector<1x1x8x8xf32>
    %121 = vector.shape_cast %120 : vector<1x1x8x8xf32> to vector<8x8xf32>
    %122 = vector.shape_cast %112 : vector<8x8xf32> to vector<1x1x8x8xf32>
    tpu.vector_store %arg14[%c0_49, %c0_50, %c0_51, %c0_52], %122 {strides = array<i32>} : memref<1x2x8x8xf32, #tpu.memory_space<vmem>>, vector<1x1x8x8xf32>,
    %c0_53 = arith.constant 0 : index
    %c0_54 = arith.constant 0 : index
    %c0_55 = arith.constant 0 : index
    %c0_56 = arith.constant 0 : index
    %123 = vector.load %arg15[%c0_53, %c0_54, %c0_55, %c0_56] : memref<1x2x8x8xf32, #tpu.memory_space<vmem>>, vector<1x1x8x8xf32>
    %124 = vector.shape_cast %123 : vector<1x1x8x8xf32> to vector<8x8xf32>
    %125 = vector.shape_cast %116 : vector<8x8xf32> to vector<1x1x8x8xf32>
    tpu.vector_store %arg15[%c0_53, %c0_54, %c0_55, %c0_56], %125 {strides = array<i32>} : memref<1x2x8x8xf32, #tpu.memory_space<vmem>>, vector<1x1x8x8xf32>,
    %126 = vector.extract_strided_slice %43 {offsets = [1, 0], sizes = [1, 3], strides = [1, 1]} : vector<2x3xf32> to vector<1x3xf32>
    %cst_57 = arith.constant 1.000000e+00 : f32
    %127 = vector.broadcast %cst_57 : f32 to vector<1x8xf32>
    %128 = vector.extract_strided_slice %126 {offsets = [0, 0], sizes = [1, 1], strides = [1, 1]} : vector<1x3xf32> to vector<1x1xf32>
    %129 = vector.extract_strided_slice %47 {offsets = [0, 0], sizes = [1, 8], strides = [1, 1]} : vector<3x8xf32> to vector<1x8xf32>
    %130 = vector.broadcast %128 : vector<1x1xf32> to vector<1x8xf32>
    %131 = arith.mulf %130, %129 : vector<1x8xf32>
    %132 = arith.addf %127, %131 : vector<1x8xf32>
    %133 = vector.extract_strided_slice %126 {offsets = [0, 1], sizes = [1, 1], strides = [1, 1]} : vector<1x3xf32> to vector<1x1xf32>
    %134 = vector.extract_strided_slice %47 {offsets = [1, 0], sizes = [1, 8], strides = [1, 1]} : vector<3x8xf32> to vector<1x8xf32>
    %135 = vector.broadcast %133 : vector<1x1xf32> to vector<1x8xf32>
    %136 = arith.mulf %135, %134 : vector<1x8xf32>
    %137 = arith.addf %132, %136 : vector<1x8xf32>
    %138 = vector.extract_strided_slice %126 {offsets = [0, 2], sizes = [1, 1], strides = [1, 1]} : vector<1x3xf32> to vector<1x1xf32>
    %139 = vector.extract_strided_slice %47 {offsets = [2, 0], sizes = [1, 8], strides = [1, 1]} : vector<3x8xf32> to vector<1x8xf32>
    %140 = vector.broadcast %138 : vector<1x1xf32> to vector<1x8xf32>
    %141 = arith.mulf %140, %139 : vector<1x8xf32>
    %142 = arith.addf %137, %141 : vector<1x8xf32>
    %143 = tpu.reciprocal %142 {approx = true} : vector<1x8xf32> -> vector<1x8xf32>
    %cst_58 = arith.constant 0.000000e+00 : f32
    %144 = vector.broadcast %cst_58 : f32 to vector<8x8xf32>
    %cst_59 = arith.constant 0.000000e+00 : f32
    %145 = vector.broadcast %cst_59 : f32 to vector<8x8xf32>
    %146 = arith.mulf %131, %143 : vector<1x8xf32>
    %147 = arith.mulf %146, %146 : vector<1x8xf32>
    %148 = vector.extract_strided_slice %49 {offsets = [0, 0], sizes = [8, 8], strides = [1, 1]} : vector<8x24xf32> to vector<8x8xf32>
    %149 = vector.broadcast %147 : vector<1x8xf32> to vector<8x8xf32>
    %150 = arith.mulf %149, %148 : vector<8x8xf32>
    %151 = arith.addf %144, %150 : vector<8x8xf32>
    %152 = vector.extract_strided_slice %51 {offsets = [0, 0], sizes = [8, 8], strides = [1, 1]} : vector<8x24xf32> to vector<8x8xf32>
    %153 = vector.broadcast %147 : vector<1x8xf32> to vector<8x8xf32>
    %154 = arith.mulf %153, %152 : vector<8x8xf32>
    %155 = arith.addf %145, %154 : vector<8x8xf32>
    %156 = arith.mulf %136, %143 : vector<1x8xf32>
    %157 = arith.mulf %156, %156 : vector<1x8xf32>
    %158 = vector.extract_strided_slice %49 {offsets = [0, 8], sizes = [8, 8], strides = [1, 1]} : vector<8x24xf32> to vector<8x8xf32>
    %159 = vector.broadcast %157 : vector<1x8xf32> to vector<8x8xf32>
    %160 = arith.mulf %159, %158 : vector<8x8xf32>
    %161 = arith.addf %151, %160 : vector<8x8xf32>
    %162 = vector.extract_strided_slice %51 {offsets = [0, 8], sizes = [8, 8], strides = [1, 1]} : vector<8x24xf32> to vector<8x8xf32>
    %163 = vector.broadcast %157 : vector<1x8xf32> to vector<8x8xf32>
    %164 = arith.mulf %163, %162 : vector<8x8xf32>
    %165 = arith.addf %155, %164 : vector<8x8xf32>
    %166 = arith.mulf %141, %143 : vector<1x8xf32>
    %167 = arith.mulf %166, %166 : vector<1x8xf32>
    %168 = vector.extract_strided_slice %49 {offsets = [0, 16], sizes = [8, 8], strides = [1, 1]} : vector<8x24xf32> to vector<8x8xf32>
    %169 = vector.broadcast %167 : vector<1x8xf32> to vector<8x8xf32>
    %170 = arith.mulf %169, %168 : vector<8x8xf32>
    %171 = arith.addf %161, %170 : vector<8x8xf32>
    %172 = vector.extract_strided_slice %51 {offsets = [0, 16], sizes = [8, 8], strides = [1, 1]} : vector<8x24xf32> to vector<8x8xf32>
    %173 = vector.broadcast %167 : vector<1x8xf32> to vector<8x8xf32>
    %174 = arith.mulf %173, %172 : vector<8x8xf32>
    %175 = arith.addf %165, %174 : vector<8x8xf32>
    %176 = vector.extract_strided_slice %26 {offsets = [0, 8], sizes = [8, 8], strides = [1, 1]} : vector<8x40xf32> to vector<8x8xf32>
    %177 = vector.extract_strided_slice %41 {offsets = [0, 8], sizes = [8, 8], strides = [1, 1]} : vector<8x40xf32> to vector<8x8xf32>
    %cst_60 = arith.constant 1.000000e+00 : f32
    %178 = vector.broadcast %cst_60 : f32 to vector<8x8xf32>
    %179 = arith.divf %178, %177 : vector<8x8xf32>
    %180 = arith.addf %179, %171 : vector<8x8xf32>
    %cst_61 = arith.constant 1.000000e+00 : f32
    %181 = vector.broadcast %cst_61 : f32 to vector<8x8xf32>
    %182 = arith.divf %181, %180 : vector<8x8xf32>
    %183 = arith.mulf %176, %179 : vector<8x8xf32>
    %184 = arith.addf %183, %175 : vector<8x8xf32>
    %185 = arith.mulf %182, %184 : vector<8x8xf32>
    %186 = math.sqrt %182 : vector<8x8xf32>
    %c0_62 = arith.constant 0 : index
    %c1 = arith.constant 1 : index
    %c0_63 = arith.constant 0 : index
    %c0_64 = arith.constant 0 : index
    %187 = vector.load %arg4[%c0_62, %c1, %c0_63, %c0_64] : memref<1x2x8x8xf32, #tpu.memory_space<vmem>>, vector<1x1x8x8xf32>
    %188 = vector.shape_cast %187 : vector<1x1x8x8xf32> to vector<8x8xf32>
    %189 = arith.mulf %186, %188 : vector<8x8xf32>
    %190 = arith.addf %185, %189 : vector<8x8xf32>
    %c0_65 = arith.constant 0 : index
    %c1_66 = arith.constant 1 : index
    %c0_67 = arith.constant 0 : index
    %c0_68 = arith.constant 0 : index
    %191 = vector.load %arg13[%c0_65, %c1_66, %c0_67, %c0_68] : memref<1x2x8x8xf32, #tpu.memory_space<vmem>>, vector<1x1x8x8xf32>
    %192 = vector.shape_cast %191 : vector<1x1x8x8xf32> to vector<8x8xf32>
    %193 = vector.shape_cast %185 : vector<8x8xf32> to vector<1x1x8x8xf32>
    tpu.vector_store %arg13[%c0_65, %c1_66, %c0_67, %c0_68], %193 {strides = array<i32>} : memref<1x2x8x8xf32, #tpu.memory_space<vmem>>, vector<1x1x8x8xf32>,
    %c0_69 = arith.constant 0 : index
    %c1_70 = arith.constant 1 : index
    %c0_71 = arith.constant 0 : index
    %c0_72 = arith.constant 0 : index
    %194 = vector.load %arg14[%c0_69, %c1_70, %c0_71, %c0_72] : memref<1x2x8x8xf32, #tpu.memory_space<vmem>>, vector<1x1x8x8xf32>
    %195 = vector.shape_cast %194 : vector<1x1x8x8xf32> to vector<8x8xf32>
    %196 = vector.shape_cast %186 : vector<8x8xf32> to vector<1x1x8x8xf32>
    tpu.vector_store %arg14[%c0_69, %c1_70, %c0_71, %c0_72], %196 {strides = array<i32>} : memref<1x2x8x8xf32, #tpu.memory_space<vmem>>, vector<1x1x8x8xf32>,
    %c0_73 = arith.constant 0 : index
    %c1_74 = arith.constant 1 : index
    %c0_75 = arith.constant 0 : index
    %c0_76 = arith.constant 0 : index
    %197 = vector.load %arg15[%c0_73, %c1_74, %c0_75, %c0_76] : memref<1x2x8x8xf32, #tpu.memory_space<vmem>>, vector<1x1x8x8xf32>
    %198 = vector.shape_cast %197 : vector<1x1x8x8xf32> to vector<8x8xf32>
    %199 = vector.shape_cast %190 : vector<8x8xf32> to vector<1x1x8x8xf32>
    tpu.vector_store %arg15[%c0_73, %c1_74, %c0_75, %c0_76], %199 {strides = array<i32>} : memref<1x2x8x8xf32, #tpu.memory_space<vmem>>, vector<1x1x8x8xf32>,
    return
  }
  func.func @transform_0(%arg0: i32) -> (i32, i32, i32) {
    %c0_i32 = arith.constant 0 : i32
    %c0_i32_0 = arith.constant 0 : i32
    %c0_i32_1 = arith.constant 0 : i32
    return %arg0, %c0_i32, %c0_i32_0 : i32, i32, i32
  }
  func.func @transform_1(%arg0: i32) -> (i32, i32, i32) {
    %c0_i32 = arith.constant 0 : i32
    %c0_i32_0 = arith.constant 0 : i32
    %c0_i32_1 = arith.constant 0 : i32
    return %arg0, %c0_i32, %c0_i32_0 : i32, i32, i32
  }
  func.func @transform_2(%arg0: i32) -> (i32, i32, i32) {
    %c0_i32 = arith.constant 0 : i32
    %c0_i32_0 = arith.constant 0 : i32
    %c0_i32_1 = arith.constant 0 : i32
    return %arg0, %c0_i32, %c0_i32_0 : i32, i32, i32
  }
  func.func @transform_3(%arg0: i32) -> (i32, i32, i32, i32) {
    %c0_i32 = arith.constant 0 : i32
    %c0_i32_0 = arith.constant 0 : i32
    %c0_i32_1 = arith.constant 0 : i32
    %c0_i32_2 = arith.constant 0 : i32
    return %arg0, %c0_i32, %c0_i32_0, %c0_i32_1 : i32, i32, i32, i32
  }
  func.func @transform_4(%arg0: i32) -> (i32, i32) {
    %c0_i32 = arith.constant 0 : i32
    %c0_i32_0 = arith.constant 0 : i32
    %c0_i32_1 = arith.constant 0 : i32
    return %c0_i32, %c0_i32_0 : i32, i32
  }
  func.func @transform_5(%arg0: i32) -> (i32, i32) {
    %c0_i32 = arith.constant 0 : i32
    %c0_i32_0 = arith.constant 0 : i32
    %c0_i32_1 = arith.constant 0 : i32
    return %c0_i32, %c0_i32_0 : i32, i32
  }
  func.func @transform_6(%arg0: i32) -> (i32, i32, i32) {
    %c0_i32 = arith.constant 0 : i32
    %c0_i32_0 = arith.constant 0 : i32
    %c0_i32_1 = arith.constant 0 : i32
    %c0_i32_2 = arith.constant 0 : i32
    return %c0_i32, %c0_i32_0, %c0_i32_1 : i32, i32, i32
  }
  func.func @transform_7(%arg0: i32) -> (i32, i32, i32) {
    %c0_i32 = arith.constant 0 : i32
    %c0_i32_0 = arith.constant 0 : i32
    %c0_i32_1 = arith.constant 0 : i32
    %c0_i32_2 = arith.constant 0 : i32
    return %c0_i32, %c0_i32_0, %c0_i32_1 : i32, i32, i32
  }
  func.func @transform_8(%arg0: i32) -> (i32, i32) {
    %c0_i32 = arith.constant 0 : i32
    %c0_i32_0 = arith.constant 0 : i32
    %c0_i32_1 = arith.constant 0 : i32
    return %c0_i32, %c0_i32_0 : i32, i32
  }
  func.func @transform_9(%arg0: i32) -> (i32, i32) {
    %c0_i32 = arith.constant 0 : i32
    %c0_i32_0 = arith.constant 0 : i32
    %c0_i32_1 = arith.constant 0 : i32
    return %c0_i32, %c0_i32_0 : i32, i32
  }
  func.func @transform_10(%arg0: i32) -> (i32, i32) {
    %c0_i32 = arith.constant 0 : i32
    %c0_i32_0 = arith.constant 0 : i32
    %c0_i32_1 = arith.constant 0 : i32
    return %c0_i32, %c0_i32_0 : i32, i32
  }
  func.func @transform_11(%arg0: i32) -> (i32, i32) {
    %c0_i32 = arith.constant 0 : i32
    %c0_i32_0 = arith.constant 0 : i32
    %c0_i32_1 = arith.constant 0 : i32
    return %c0_i32, %c0_i32_0 : i32, i32
  }
  func.func @transform_12(%arg0: i32) -> (i32, i32, i32, i32) {
    %c0_i32 = arith.constant 0 : i32
    %c0_i32_0 = arith.constant 0 : i32
    %c0_i32_1 = arith.constant 0 : i32
    %c0_i32_2 = arith.constant 0 : i32
    return %arg0, %c0_i32, %c0_i32_0, %c0_i32_1 : i32, i32, i32, i32
  }
  func.func @transform_13(%arg0: i32) -> (i32, i32, i32, i32) {
    %c0_i32 = arith.constant 0 : i32
    %c0_i32_0 = arith.constant 0 : i32
    %c0_i32_1 = arith.constant 0 : i32
    %c0_i32_2 = arith.constant 0 : i32
    return %arg0, %c0_i32, %c0_i32_0, %c0_i32_1 : i32, i32, i32, i32
  }
  func.func @transform_14(%arg0: i32) -> (i32, i32, i32, i32) {
    %c0_i32 = arith.constant 0 : i32
    %c0_i32_0 = arith.constant 0 : i32
    %c0_i32_1 = arith.constant 0 : i32
    %c0_i32_2 = arith.constant 0 : i32
    return %arg0, %c0_i32, %c0_i32_0, %c0_i32_1 : i32, i32, i32, i32
  }
}

</mosaic_0001>

<bundles_post_ra>
// kernel: tpu_custom_call.1
= control target key start
LH: loop header
LB: loop body
LE: loop exit
PB: predicated region body
PF: predicated region fallthrough
CT: control target
= control target key end

     0   :  { %s1819_s0 = inlined_call_operand.vmem [shape: bf16[2,16,40], index: 0, kind: input, shape index: {}]   ;;  %s1820_s1 = inlined_call_operand.vmem [shape: f32[2,2,3], index: 1, kind: input, shape index: {}]   ;;  %s1821_s2 = inlined_call_operand.vmem [shape: f32[2,3,8], index: 2, kind: input, shape index: {}]   ;;  %s1822_s3 = inlined_call_operand.vmem [shape: f32[2,2,8,8], index: 3, kind: input, shape index: {}]   ;;  %s1823_s4 = inlined_call_operand.vmem [shape: bf16[8,16], index: 4, kind: input, shape index: {}]   ;;  %s1824_s5 = inlined_call_operand.vmem [shape: f32[8,1], index: 5, kind: input, shape index: {}]   ;;  %s1825_s6 = inlined_call_operand.vmem [shape: bf16[1,8,8], index: 6, kind: input, shape index: {}]   ;;  %s1826_s7 = inlined_call_operand.vmem [shape: f32[1,8,1], index: 7, kind: input, shape index: {}]   ;;  %s1827_s8 = inlined_call_operand.vmem [shape: bf16[8,8], index: 8, kind: input, shape index: {}]   ;;  %s1828_s9 = inlined_call_operand.vmem [shape: f32[8,1], index: 9, kind: input, shape index: {}]   ;;  %s1829_s10 = inlined_call_operand.vmem [shape: bf16[8,8], index: 10, kind: input, shape index: {}]   ;;  %s1830_s11 = inlined_call_operand.vmem [shape: f32[8,1], index: 11, kind: input, shape index: {}]   ;;  %s1831_s12 = inlined_call_operand.hbm [shape: f32[2,2,8,8], index: 12, kind: output, shape index: {0}]   ;;  %s1832_s13 = inlined_call_operand.hbm [shape: f32[2,2,8,8], index: 13, kind: output, shape index: {1}]   ;;  %s1833_s14 = inlined_call_operand.hbm [shape: f32[2,2,8,8], index: 14, kind: output, shape index: {2}]  }
   0x1   :  { %1841 = sst [smem:[#allocation13_spill]] %s1819_s0 }
   0x2   :  { %1842 = sst [smem:[#allocation14_spill]] %s1820_s1 }
   0x3   :  { %1843 = sst [smem:[#allocation15_spill]] %s1821_s2 }
   0x4   :  { %1844 = sst [smem:[#allocation16_spill]] %s1824_s5 }
   0x5   :  { %1845 = sst [smem:[#allocation17_spill]] %s1830_s11 }
   0x6   :  { %20 = vsyncpa [#allocation3], 0 }
   0x7   :  { %22 = vsyncpa [#allocation3 + $0x1], 0 }
   0x8   :  { %23 = vsyncpa [#allocation5], 0 }
   0x9   :  { %25 = vsyncpa [#allocation5 + $0x1], 0  ;;  %s1544_s29 = smov 0   ;;  %s1546_s30 = smov 0  }
   0xa   :  { %s1548_s15 = smov 0   ;;  %s1550_s16 = smov 0  }
   0xb LB: > { %1846 = sst [smem:[#allocation9_spill]] %s1449_s15  ;;  %s1565_s17 = sadd.s32 4294967295, %s1453_s16   ;;  %s1453_s16 = sphi %s1550_s16, %s1860_s16   ;;  %s1449_s15 = sphi %s1548_s15, %s1862_s15   ;;  %s1445_s30 = sphi %s1546_s30, %s1864_s30   ;;  %s1441_s29 = sphi %s1544_s29, %s1863_s29  }
   0xc   : > { %s1834_s18 = sadd.s32 4294967294, %s1453_s16   ;;  %s1569_s19 = sadd.s32 1, %s1453_s16  }
   0xd   : > { %1847 = sst [smem:[#allocation10_spill]] %s1569_s19  ;;  %s310_s20 = sadd.s32 1, %s1449_s15 }
   0xe   : > { %s307_s21 = ssub.s32 %s1453_s16, %s1569_s19  ;;  %p320_p0 = scmp.ne.s32.totalorder %s1449_s15, %s1445_s30 }
   0xf   : > { %p308_p1 = scmp.eq.s32.totalorder %s307_s21, 0  ;;  %p321_p2 = scmp.eq.s32.totalorder %s1565_s17, 1 }
  0x10   : > { %p326_p3 = scmp.ne.s32.totalorder %s1445_s30, %s1441_s29  ;;  %p327_p4 = scmp.eq.s32.totalorder %s1834_s18, 1 }
  0x11   : > { %s1582_s22 = scalar_select %p308_p1, %s1449_s15, %s310_s20  }
  0x12   : > { %p1584_p5 = por %p321_p2, %p320_p0  ;;  %p1588_p6 = por %p327_p4, %p326_p3 }
  0x13   : > { %1848 = sst [smem:[#allocation11_spill]] %s1582_s22  ;;  %p1181_p7 = scmp.ge.s32.totalorder %s1453_s16, 1 }
  0x14   : > { %s1850_s24 = scalar_select %p1588_p6, 1, 0 }
  0x15   : > { %p451_p8 = scmp.lt.s32.totalorder %s1453_s16, 3 }
  0x16   : > { %1851 = sst [smem:[#allocation12_spill]] %s1850_s24 }
  0x17   : > { %p452_p9 = pnand %p1181_p7, %p451_p8 }
  0x18   : > { %p520_p10 = scmp.lt.s32.totalorder (!%p452_p9), %s1565_s17, 1  ;;  %v1455_v0 = vmov (!%p452_p9), 0.0   ;;  %vm1456_vm0 = vmmov (!%p452_p9), 0   ;;  %s1852_s5 = sld [smem:[#allocation16_spill]] (!%p452_p9)  ;;  %v1457_v3 = vmov (!%p452_p9), 0   ;;  %v605_v4 = vld [vmem:[%s1826_s7] sm:$0xff] (!%p452_p9) }
  0x19   : > { %455 = sbr.rel (%p452_p9) target bundleno = 1180 (0x49c), region = 68  ;;  %1224 = vmatprep.subr.bf16.mxu0 (!%p452_p9), %v1455_v0  ;;  %1226 = vmatprep.mubr.msk.bf16.mxu0 (!%p452_p9), %vm1456_vm0, %v1455_v0  ;;  %s1853_s11 = sld [smem:[#allocation17_spill]] (!%p452_p9)  ;;  %v544_v5 = vld [vmem:[%s1828_s9] sm:$0xff] (!%p452_p9)  ;;  %vm558_vm1 = vcmask (!%p452_p9), 130048   ;;  %v1458_v9 = vmov (!%p452_p9), 1   ;;  %v1459_v10 = vmov (!%p452_p9), 2  }
  0x1a   : > { %1308 = vset.pattern.permute.xlu0 (!%p452_p9), %v1457_v3  ;;  %1309 = vset.pattern.permute.xlu1 (!%p452_p9), %v1457_v3  ;;  %s1854_s0 = sld [smem:[#allocation13_spill]] (!%p452_p9)  ;;  %s1855_s1 = sld [smem:[#allocation14_spill]] (!%p452_p9)  ;;  %v541_v7 = vld [vmem:[%s1823_s4] sm:$0xf] (!%p452_p9)  ;;  %vm615_vm2 = vcmask (!%p452_p9), 1043456   ;;  %vm611_vm3 = vcmask (!%p452_p9), 64512  }
  0x1b   : > { %1230 = vmatprep.subr.bf16.mxu1 (!%p452_p9), %v1455_v0  ;;  %1232 = vmatprep.mubr.msk.bf16.mxu1 (!%p452_p9), %vm1456_vm0, %v1455_v0  ;;  %v603_v20 = vld [vmem:[%s1825_s6] sm:$0xf] (!%p452_p9)  ;;  %s1460_s25 = smov (!%p452_p9), 96   ;;  %s1461_s26 = smov (!%p452_p9), 112  }
  0x1c   : > { %v545_v30 = vld [vmem:[%s1829_s10] sm:$0xf] (!%p452_p9)  ;;  %s1856_s2 = sld [smem:[#allocation15_spill]] (!%p452_p9)  ;;  %s1464_s18 = smov (!%p452_p9), 120  }
  0x1d   : > { %v543_v31 = vld [vmem:[%s1827_s8] sm:$0xf] (!%p452_p9) }
  0x1e   : > { %v542_v1 = vld [vmem:[%s1852_s5] sm:$0xff] (!%p452_p9) }
  0x1f   : > { %v546_v2 = vld [vmem:[%s1853_s11] sm:$0xff] (!%p452_p9)  ;;  %549 = vperm.xlu0 (!%p452_p9), %1308, %v542_v1  }
  0x20   : > { %s1603_s20 = scalar_select %p520_p10, %s1565_s17, 1  ;;  %714 = vperm.xlu1 %1309, %v546_v2  }
  0x22   : > { %s1211_s21 = sshll.u32 %s1603_s20, 3  ;;  %s1187_s27 = sshll.u32 %s1603_s20, 1 }
  0x23   : > { %s524_s11 = scalar_lea.vmem %s1854_s0, %s1211_s21  ;;  %s528_s24 = scalar_lea.vmem %s1855_s1, %s1187_s27  ;;  %608 = vperm.xlu0 %1308, %v605_v4  }
  0x24   : > { %v1312_v6 = vld [vmem:[%s524_s11] sm:$0xff]   ;;  %663 = vperm.xlu1 %1309, %v544_v5   ;;  %s1462_s27 = smov 104   ;;  %s1188_s28 = sshll.u32 %s1603_s20, 2 }
  0x25   : > { %1225 = vmatpush3.bf16.msra.mxu0 %v1312_v6  ;;  %v777_v8 = vld [vmem:[%s528_s24] sm:$0x3]  ;;  %s532_s5 = scalar_lea.vmem %s1856_s2, %s1188_s28  ;;  %s1212_s11 = sshll.u32 %s1603_s20, 4 }
  0x26   : > { %1236 = vmatprep.subr.bf16.mxu0 %v1455_v0  ;;  %v778_v61 = vld [vmem:[%s532_s5] sm:$0x7]  ;;  %s537_s24 = scalar_lea.vmem %s1822_s3, %s1212_s11  ;;  %s1839_s21 = smov 8  }
  0x27   : > { %784 = vperm.xlu0 %1308, %v777_v8   ;;  %v779_v62 = vsub.f32 1.0, %v778_v61  ;;  %s503_s20 = sand.u32 1, %s1445_s30   ;;  %s1682_s5 = sshll.u32 %s1565_s17, 8 }
  0x28   : > { %1227 = vmatmul.mubr.msk.bf16.vlgmr.msra.gmra.mrb[0].mxu0 %vm558_vm1, %v541_v7  ;;  %1310 = vset.pattern.permute.xlu1 %v1458_v9  ;;  %s1690_s19 = scalar_lea.hbm %s1831_s12, %s1682_s5 }
  0x29   : > { %1238 = vmatprep.mubr.msk.bf16.mxu0 %vm1456_vm0, %v1455_v0  ;;  %790 = vperm.xlu1 %1310, %v777_v8   ;;  %v878_v63 = vrot.slane %v779_v62, 7  ;;  %v794_v2 = vrot.slane %v779_v62, 1  ;;  %v802_v7 = vrot.slane %v779_v62, 2 }
  0x2b   : > { %1311 = vset.pattern.permute.xlu0 %v1459_v10 }
  0x2c   : > { %799 = vperm.xlu0 %1311, %v777_v8  }
  0x9e   : > { %v550_v11 = vpop.permute.xlu0 %549 }
  0x9f   : > { %v715_v32 = vpop.permute.xlu1 %714 }
  0xa2   : > { %v609_v21 = vpop.permute.xlu0 %608 }
  0xa3   : > { %v664_v58 = vpop.permute.xlu1 %663 }
  0xa8   : > { %v791_v4 = vpop.permute.xlu1 %790 }
  0xa9   : > { %v796_v6 = vmul.f32 %v794_v2, %v791_v4  ;;  %v882_v9 = vmul.f32 %v791_v4, %v779_v62 }
  0xfb   : > { %v596_v12 = vpop.f32.mrb[0].mxu0 }
  0xfc   : > { %v597_v13 = vadd.f32 %v596_v12, %v550_v11  ;;  %v1228_v14 = vpop.f32.mrb[1].mxu0 }
  0xfd   : > { %v599_v15 = vpop.f32.mrb[2].mxu0 }
  0xfe   : > { %v602_v16 = vmax.f32 %v597_v13, 0.0  ;;  %v1229_v17 = vpop.f32.mrb[3].mxu0 }
  0xff   : > { %v809_v17 = vlaneseq }
 0x100   : > { %v604_v18 = vpack.c.bf16 %v602_v16, %v602_v16 }
 0x102   : > { %v617_v19 = vsel %vm615_vm2, %v604_v18, 0 }
 0x103   : > { %1231 = vmatpush3.bf16.msra.mxu1 %v617_v19 }
 0x104   : > { %1242 = vmatprep.subr.bf16.mxu1 %v1455_v0 }
 0x106   : > { %1233 = vmatmul.mubr.msk.bf16.vlgmr.msra.gmra.mrb[0].mxu1 %vm611_vm3, %v603_v20  ;;  %v810_v20 = vshrl.u32 %v809_v17, 7 }
 0x107   : > { %1244 = vmatprep.mubr.msk.bf16.mxu1 %vm1456_vm0, %v1455_v0  ;;  %v785_v0 = vpop.permute.xlu0 %784 }
 0x108   : > { %v787_v1 = vmul.f32 %v785_v0, %v779_v62  ;;  %v880_v3 = vmul.f32 %v878_v63, %v785_v0  ;;  %v1196_v63 = vld [vmem:[%s537_s24 + $0x8] sm:$0xff] }
 0x10a   : > { %v788_v5 = vadd.f32 1.0, %v787_v1  ;;  %v881_v8 = vadd.f32 1.0, %v880_v3 }
 0x10b   : > { %v800_v10 = vpop.permute.xlu0 %799 }
 0x10c   : > { %v797_v11 = vadd.f32 %v796_v6, %v788_v5  ;;  %v804_v12 = vmul.f32 %v802_v7, %v800_v10  ;;  %v883_v13 = vadd.f32 %v882_v9, %v881_v8  ;;  %v884_v14 = vmul.f32 %v800_v10, %v794_v2 }
 0x10e   : > { %v805_v15 = vadd.f32 %v804_v12, %v797_v11  ;;  %v885_v16 = vadd.f32 %v884_v14, %v883_v13  ;;  %v872_v13 = vld [vmem:[%s537_s24] sm:$0xff]  ;;  %s1696_s24 = scalar_lea.sflag [#allocation3], %s503_s20 }
 0x1d9   : > { %v653_v22 = vpop.f32.mrb[0].mxu1 }
 0x1da   : > { %v654_v23 = vadd.f32 %v653_v22, %v609_v21  ;;  %v1234_v24 = vpop.f32.mrb[1].mxu1 }
 0x1db   : > { %v656_v25 = vpop.f32.mrb[2].mxu1 }
 0x1dc   : > { %v659_v26 = vmax.f32 %v654_v23, 0.0  ;;  %v1235_v27 = vpop.f32.mrb[3].mxu1 }
 0x1dd   : > { %v811_v27 = vsub.s32 0, %v810_v20 }
 0x1de   : > { %v660_v28 = vpack.c.bf16 %v659_v26, %v659_v26 }
 0x1e0   : > { %v670_v29 = vsel %vm615_vm2, %v660_v28, 0  ;;  %v891_v28 = vsub.s32 1, %v810_v20 }
 0x1e1   : > { %1237 = vmatpush3.bf16.msra.mxu0 %v670_v29  ;;  %1243 = vmatpush3.bf16.msra.mxu1 %v670_v29 }
 0x1e4   : > { %1245 = vmatmul.mubr.msk.bf16.vlgmr.msra.gmra.mrb[4].mxu1 %vm611_vm3, %v545_v30  ;;  %1239 = vmatmul.mubr.msk.bf16.vlgmr.msra.gmra.mrb[4].mxu0 %vm611_vm3, %v543_v31 }
 0x2b7   : > { %v754_v33 = vpop.f32.mrb[4].mxu1  ;;  %v706_v34 = vpop.f32.mrb[4].mxu0 }
 0x2b8   : > { %v755_v35 = vadd.f32 %v754_v33, %v715_v32  ;;  %v1246_v36 = vpop.f32.mrb[5].mxu1  ;;  %v1240_v37 = vpop.f32.mrb[5].mxu0  ;;  %v707_v59 = vadd.f32 %v706_v34, %v664_v58 }
 0x2b9   : > { %v757_v38 = vpop.f32.mrb[6].mxu1  ;;  %v709_v39 = vpop.f32.mrb[6].mxu0 }
 0x2ba   : > { %v761_v40 = vmin.f32 %v755_v35, 20.0  ;;  %v1247_v41 = vpop.f32.mrb[7].mxu1  ;;  %v1241_v42 = vpop.f32.mrb[7].mxu0  ;;  %vm760_vm5 = vcmp.gt.f32.partialorder %v755_v35, 20.0 }
 0x2bc   : > { %v762_v43 = vmul.f32 1.442695, %v761_v40 }
 0x2be   : > { %1313 = vpow2.f32 %v762_v43 }
 0x2c8   : > { %v1314_v44 = vpop.eup %1313 }
 0x2c9   : > { %v764_v45 = vadd.f32 1.0, %v1314_v44  ;;  %v767_v46 = vmul.f32 -0.5, %v1314_v44  ;;  %v770_v48 = vand.u32 2147483647, %v1314_v44 }
 0x2cb   : > { %1315 = vlog2.f32 %v764_v45  ;;  %v768_v47 = vadd.f32 1.0, %v767_v46  ;;  %vm771_vm4 = vcmp.lt.f32.partialorder %v770_v48, 0.0004427343 }
 0x2cd   : > { %v769_v51 = vmul.f32 %v1314_v44, %v768_v47 }
 0x2d5   : > { %v1316_v49 = vpop.eup %1315 }
 0x2d6   : > { %v766_v50 = vmul.f32 0.6931472, %v1316_v49 }
 0x2d8   : > { %v772_v52 = vsel %vm771_vm4, %v769_v51, %v766_v50 }
 0x2d9   : > { %v773_v53 = vsel %vm760_vm5, %v755_v35, %v772_v52 }
 0x2da   : > { %v774_v54 = vmul.f32 0.9, %v773_v53 }
 0x2dc   : > { %v775_v55 = vadd.f32 0.1, %v774_v54 }
 0x2de   : > { %v776_v56 = vmul.f32 %v775_v55, %v775_v55 }
 0x2e0   : > { %1317 = vrcp.f32 %v776_v56 }
 0x2e1   : > { %1319 = vrcp.f32 %v805_v15 }
 0x2e2   : > { %1321 = vrcp.f32 %v885_v16 }
 0x2ea   : > { %v1639_v57 = vpop.eup %1317 }
 0x2eb   : > { %847 = vrot.lane.b32.xlu0 %v1639_v57, %s1460_s25  ;;  %814 = vrot.lane.b32.xlu1 %v1639_v57, %s1461_s26  ;;  %v1644_v60 = vmul.f32 %v1639_v57, %v707_v59  ;;  %v1320_v18 = vpop.eup %1319 }
 0x2ec   : > { %v1322_v19 = vpop.eup %1321  ;;  %v807_v21 = vmul.f32 %v1320_v18, %v787_v1  ;;  %v825_v23 = vmul.f32 %v1320_v18, %v796_v6  ;;  %v841_v25 = vmul.f32 %v1320_v18, %v804_v12 }
 0x2ed   : > { %v887_v22 = vmul.f32 %v1322_v19, %v880_v3  ;;  %v897_v24 = vmul.f32 %v1322_v19, %v882_v9  ;;  %v907_v26 = vmul.f32 %v1322_v19, %v884_v14 }
 0x2ee   : > { %v808_v29 = vmul.f32 %v807_v21, %v807_v21  ;;  %v826_v31 = vmul.f32 %v825_v23, %v825_v23  ;;  %v842_v33 = vmul.f32 %v841_v25, %v841_v25 }
 0x2ef   : > { %831 = vrot.lane.b32.xlu1 %v1639_v57, %s1462_s27  ;;  %836 = vrot.lane.b32.xlu0 %v1644_v60, %s1462_s27  ;;  %v888_v30 = vmul.f32 %v887_v22, %v887_v22  ;;  %v898_v32 = vmul.f32 %v897_v24, %v897_v24  ;;  %v908_v34 = vmul.f32 %v907_v26, %v907_v26 }
 0x2f0   : > { %v812_v37 = vrot.slane %v808_v29, %v811_v27  ;;  %v830_v39 = vrot.slane %v826_v31, %v811_v27  ;;  %v846_v41 = vrot.slane %v842_v33, %v811_v27 }
 0x2f1   : > { %v892_v38 = vrot.slane %v888_v30, %v891_v28  ;;  %v902_v40 = vrot.slane %v898_v32, %v891_v28  ;;  %v912_v42 = vrot.slane %v908_v34, %v891_v28 }
 0x2f3   : > { %820 = vrot.lane.b32.xlu1 %v1644_v60, %s1461_s26 }
 0x2f7   : > { %852 = vrot.lane.b32.xlu1 %v1644_v60, %s1460_s25  ;;  %s1182_s25 = sshll.u32 %s503_s20, 4 }
 0x2f8   : > { %s1666_s26 = scalar_lea.vmem [#allocation2], %s1182_s25  ;;  %s1670_s27 = scalar_lea.vmem [#allocation4], %s1182_s25 }
 0x2f9   : > { %s1674_s28 = scalar_lea.vmem [#allocation6], %s1182_s25  ;;  %s987_s22 = sshll.u32 %s1666_s26, 4  ;;  %s1684_s22 = int_to_ptr.vmem [resolvable:$true] %s987_s22 }
 0x2fa   : > { %s1331_s25 = scalar_lea.vmem %s1684_s22, 256 }
 0x2fb   : > { %p1332_p11 = scmp.ne.s32.totalorder %s1684_s22, %s1331_s25 }
 0x2fd   : > { %p1333_p12 = pnand %p1332_p11, %p1584_p5 }
 0x2ff   : > { %p1334_p13 = pneg %p1333_p12 }
 0x35d   : > { %v815_v35 = vpop.permute.xlu1 %814  ;;  %v848_v36 = vpop.permute.xlu0 %847 }
 0x35e   : > { %v817_v44 = vmul.f32 %v815_v35, %v812_v37  ;;  %v893_v45 = vmul.f32 %v892_v38, %v815_v35  ;;  %v850_v48 = vmul.f32 %v848_v36, %v846_v41  ;;  %v913_v49 = vmul.f32 %v912_v42, %v848_v36 }
 0x361   : > { %v832_v43 = vpop.permute.xlu1 %831  ;;  %v837_v52 = vpop.permute.xlu0 %836 }
 0x362   : > { %v834_v46 = vmul.f32 %v832_v43, %v830_v39  ;;  %v903_v47 = vmul.f32 %v902_v40, %v832_v43  ;;  %v905_v59 = vmul.f32 %v902_v40, %v837_v52  ;;  %v839_v2 = vmul.f32 %v837_v52, %v830_v39 }
 0x364   : > { %v835_v50 = vadd.f32 %v834_v46, %v817_v44  ;;  %v904_v51 = vadd.f32 %v903_v47, %v893_v45 }
 0x365   : > { %v821_v53 = vpop.permute.xlu1 %820 }
 0x366   : > { %v851_v54 = vadd.f32 %v850_v48, %v835_v50  ;;  %v895_v55 = vmul.f32 %v892_v38, %v821_v53  ;;  %v914_v56 = vadd.f32 %v913_v49, %v904_v51  ;;  %v823_v61 = vmul.f32 %v821_v53, %v812_v37 }
 0x368   : > { %v859_v58 = vadd.f32 %v1639_v57, %v851_v54  ;;  %918 = vrot.lane.b32.xlu0 %v914_v56, %s1839_s21  ;;  %v906_v0 = vadd.f32 %v905_v59, %v895_v55  ;;  %v840_v5 = vadd.f32 %v839_v2, %v823_v61 }
 0x369   : > { %v853_v62 = vpop.permute.xlu1 %852 }
 0x36a   : > { %1323 = vrcp.f32 %v859_v58  ;;  %v915_v1 = vmul.f32 %v912_v42, %v853_v62  ;;  %v855_v3 = vmul.f32 %v853_v62, %v846_v41 }
 0x36c   : > { %v916_v4 = vadd.f32 %v915_v1, %v906_v0  ;;  %940 = vrot.lane.b32.xlu0 %v1196_v63, %s1839_s21  ;;  %v856_v6 = vadd.f32 %v855_v3, %v840_v5 }
 0x36e   : > { %925 = vrot.lane.b32.xlu1 %v916_v4, %s1839_s21  ;;  %v863_v7 = vadd.f32 %v856_v6, %v1644_v60 }
 0x374   : > { %v1324_v8 = vpop.eup %1323 }
 0x375   : > { %v864_v9 = vmul.f32 %v1324_v8, %v863_v7  ;;  %1325 = vrsqrt.f32 %v1324_v8  ;;  %vm867_vm6 = vcmp.eq.f32.partialorder %v1324_v8, inf  ;;  %v870_v12 = vand.u32 2147483648, %v1324_v8 }
 0x376   : > { %vm869_vm7 = vcmp.eq.f32.partialorder %v1324_v8, 0.0 }
 0x377   : > { %875 = vst.msk [vmem:[%s1666_s26] sm:$0xff] %vm611_vm3, %v864_v9 }
 0x37f   : > { %v1326_v10 = vpop.eup %1325 }
 0x380   : > { %v866_v11 = vmul.f32 %v1326_v10, %v1324_v8 }
 0x382   : > { %v868_v14 = vsel %vm867_vm6, %v1324_v8, %v866_v11 }
 0x383   : > { %v871_v15 = vsel %vm869_vm7, %v870_v12, %v868_v14 }
 0x384   : > { %v873_v16 = vmul.f32 %v872_v13, %v871_v15  ;;  %876 = vst.msk [vmem:[%s1670_s27] sm:$0xff] %vm611_vm3, %v871_v15 }
 0x386   : > { %v874_v17 = vadd.f32 %v873_v16, %v864_v9 }
 0x388   : > { %877 = vst.msk [vmem:[%s1674_s28] sm:$0xff] %vm611_vm3, %v874_v17 }
 0x3da   : > { %v919_v18 = vpop.permute.xlu0 %918 }
 0x3db   : > { %v921_v19 = vadd.f32 %v1639_v57, %v919_v18 }
 0x3dd   : > { %1327 = vrcp.f32 %v921_v19 }
 0x3de   : > { %v941_v27 = vpop.permute.xlu0 %940 }
 0x3e0   : > { %v926_v20 = vpop.permute.xlu1 %925 }
 0x3e1   : > { %v928_v21 = vadd.f32 %v926_v20, %v1644_v60 }
 0x3e7   : > { %v1328_v22 = vpop.eup %1327 }
 0x3e8   : > { %v929_v23 = vmul.f32 %v1328_v22, %v928_v21  ;;  %1329 = vrsqrt.f32 %v1328_v22  ;;  %vm932_vm8 = vcmp.eq.f32.partialorder %v1328_v22, inf  ;;  %v935_v26 = vand.u32 2147483648, %v1328_v22 }
 0x3e9   : > { %vm934_vm9 = vcmp.eq.f32.partialorder %v1328_v22, 0.0 }
 0x3ea   : > { %946 = vrot.lane.b32.xlu0 %v929_v23, %s1464_s18 }
 0x3f2   : > { %v1330_v24 = vpop.eup %1329 }
 0x3f3   : > { %v931_v25 = vmul.f32 %v1330_v24, %v1328_v22 }
 0x3f5   : > { %v933_v28 = vsel %vm932_vm8, %v1328_v22, %v931_v25 }
 0x3f6   : > { %v936_v57 = vsel %vm934_vm9, %v935_v26, %v933_v28 }
 0x3f7   : > { %v943_v29 = vmul.f32 %v941_v27, %v936_v57  ;;  %952 = vrot.lane.b32.xlu1 %v936_v57, %s1464_s18 }
 0x3f9   : > { %v944_v60 = vadd.f32 %v943_v29, %v929_v23 }
 0x3fb   : > { %958 = vrot.lane.b32.xlu1 %v944_v60, %s1464_s18  ;;  %s1465_s18 = smov [#allocation2]  }
 0x3fc   : > { %s1335_s21 = sshll.u32 %s1465_s18, 4  ;;  %s1336_s21 = int_to_ptr.vmem [resolvable:$false] %s1335_s21 }
 0x3fd   : > { %s1337_s11 = scalar_lea.vmem %s1336_s21, 512  ;;  %p1338_p0 = scmp.lt.s32.totalorder %s1684_s22, %s1336_s21 }
 0x3fe   : > { %p1339_p1 = scmp.lt.s32.totalorder %s1337_s11, %s1331_s25 }
 0x400   : > { %p1340_p2 = por %p1339_p1, %p1338_p0 }
 0x402   : > { %p1341_p3 = pnand %p1340_p2, %p1334_p13 }
 0x45c   : > { %v947_v30 = vpop.permute.xlu0 %946 }
 0x45d   : > { %1197 = vst.msk [vmem:[%s1666_s26 + $0x8] sm:$0xff] %vm611_vm3, %v947_v30 }
 0x45e   : > { %1344 = shalt.err (!%p1341_p3)
}
 0x45f   : > { %s1345_s20 = scalar_lea.hbm %s1690_s19, 256  ;;  %s1349_s18 = scalar_lea.hbm %s1831_s12, 512 }
 0x460   : > { %p1346_p4 = scmp.ne.s32.totalorder %s1690_s19, %s1345_s20  ;;  %p1350_p9 = scmp.lt.u32.totalorder %s1690_s19, %s1831_s12 }
 0x461   : > { %p1351_p10 = scmp.lt.u32.totalorder %s1349_s18, %s1345_s20  ;;  %p1353_p12 = scmp.lt.u32.totalorder %s1345_s20, %s1690_s19 }
 0x462   : > { %p1347_p7 = pnand %p1346_p4, %p1584_p5 }
 0x463   : > { %p1352_p11 = por %p1351_p10, %p1350_p9 }
 0x464   : > { %p1348_p8 = pneg %p1347_p7 }
 0x465   : > { %p1354_p13 = por %p1353_p12, %p1352_p11 }
 0x467   : > { %p1355_p0 = pnand %p1354_p13, %p1348_p8 }
 0x469   : > { %1358 = shalt.err (!%p1355_p0)
}
 0x46a   : > { %s1466_s25 = smov 128   ;;  %s1857_s11 = smov 8   ;;  %v953_v31 = vpop.permute.xlu1 %952 }
 0x46b   : > { %1248 = dma.vmem_to_hbm [thread:$0]  (%p1584_p5), %s1684_s22, 256, %s1690_s19, %s1696_s24, %s1466_s25, %s1466_s25, %s1857_s11  }
 0x46c   : > { %s1003_s0 = sshll.u32 %s1670_s27, 4  ;;  %s968_s20 = sand.u32 1, %s1565_s17   ;;  %1198 = vst.msk [vmem:[%s1670_s27 + $0x8] sm:$0xff] %vm611_vm3, %v953_v31  ;;  %s1725_s0 = int_to_ptr.vmem [resolvable:$true] %s1003_s0 }
 0x46d   : > { %s1731_s18 = scalar_lea.hbm %s1832_s13, %s1682_s5  ;;  %s1019_s21 = sshll.u32 %s1674_s28, 4  ;;  %s1765_s21 = int_to_ptr.vmem [resolvable:$true] %s1019_s21 }
 0x46e   : > { %s1736_s1 = scalar_lea.sflag [#allocation5], %s968_s20  ;;  %s1359_s2 = scalar_lea.vmem %s1725_s0, 256 }
 0x46f   : > { %p1360_p1 = scmp.ne.s32.totalorder %s1725_s0, %s1359_s2  ;;  %s1467_s17 = smov [#allocation4]  }
 0x470   : > { %s1363_s22 = sshll.u32 %s1467_s17, 4  ;;  %s1364_s22 = int_to_ptr.vmem [resolvable:$false] %s1363_s22 }
 0x471   : > { %p1361_p2 = pnand %p1360_p1, %p1584_p5  ;;  %s1365_s19 = scalar_lea.vmem %s1364_s22, 512 }
 0x472   : > { %p1366_p4 = scmp.lt.s32.totalorder %s1725_s0, %s1364_s22  ;;  %p1367_p7 = scmp.lt.s32.totalorder %s1365_s19, %s1359_s2 }
 0x473   : > { %p1362_p3 = pneg %p1361_p2 }
 0x474   : > { %p1368_p8 = por %p1367_p7, %p1366_p4 }
 0x476   : > { %p1369_p9 = pnand %p1368_p8, %p1362_p3 }
 0x478   : > { %1372 = shalt.err (!%p1369_p9)
}
 0x479   : > { %s1373_s27 = scalar_lea.hbm %s1731_s18, 256  ;;  %s1377_s26 = scalar_lea.hbm %s1832_s13, 512 }
 0x47a   : > { %p1374_p10 = scmp.ne.s32.totalorder %s1731_s18, %s1373_s27  ;;  %p1378_p13 = scmp.lt.u32.totalorder %s1731_s18, %s1832_s13 }
 0x47b   : > { %p1379_p0 = scmp.lt.u32.totalorder %s1377_s26, %s1373_s27  ;;  %p1381_p2 = scmp.lt.u32.totalorder %s1373_s27, %s1731_s18 }
 0x47c   : > { %p1375_p11 = pnand %p1374_p10, %p1584_p5 }
 0x47d   : > { %p1380_p1 = por %p1379_p0, %p1378_p13 }
 0x47e   : > { %p1376_p12 = pneg %p1375_p11 }
 0x47f   : > { %p1382_p3 = por %p1381_p2, %p1380_p1 }
 0x481   : > { %p1383_p4 = pnand %p1382_p3, %p1376_p12 }
 0x483   : > { %1386 = shalt.err (!%p1383_p4)
}
 0x484   : > { %1249 = dma.vmem_to_hbm [thread:$0]  (%p1584_p5), %s1725_s0, 256, %s1731_s18, %s1736_s1, %s1466_s25, %s1466_s25, %s1857_s11   ;;  %v959_v32 = vpop.permute.xlu1 %958 }
 0x485   : > { %s1771_s19 = scalar_lea.hbm %s1833_s14, %s1682_s5  ;;  %1199 = vst.msk [vmem:[%s1674_s28 + $0x8] sm:$0xff] %vm611_vm3, %v959_v32  ;;  %s1387_s27 = scalar_lea.vmem %s1765_s21, 256 }
 0x486   : > { %p1388_p7 = scmp.ne.s32.totalorder %s1765_s21, %s1387_s27  ;;  %s1468_s0 = smov [#allocation6]  }
 0x487   : > { %s1391_s18 = sshll.u32 %s1468_s0, 4  ;;  %s1392_s18 = int_to_ptr.vmem [resolvable:$false] %s1391_s18 }
 0x488   : > { %p1389_p8 = pnand %p1388_p7, %p1584_p5  ;;  %s1393_s24 = scalar_lea.vmem %s1392_s18, 512 }
 0x489   : > { %p1394_p10 = scmp.lt.s32.totalorder %s1765_s21, %s1392_s18  ;;  %p1395_p11 = scmp.lt.s32.totalorder %s1393_s24, %s1387_s27 }
 0x48a   : > { %p1390_p9 = pneg %p1389_p8 }
 0x48b   : > { %p1396_p12 = por %p1395_p11, %p1394_p10 }
 0x48d   : > { %p1397_p13 = pnand %p1396_p12, %p1390_p9 }
 0x48f   : > { %1400 = shalt.err (!%p1397_p13)
}
 0x490   : > { %s1401_s28 = scalar_lea.hbm %s1771_s19, 256  ;;  %s1405_s26 = scalar_lea.hbm %s1833_s14, 512 }
 0x491   : > { %p1402_p0 = scmp.ne.s32.totalorder %s1771_s19, %s1401_s28  ;;  %p1406_p3 = scmp.lt.u32.totalorder %s1771_s19, %s1833_s14 }
 0x492   : > { %p1407_p4 = scmp.lt.u32.totalorder %s1405_s26, %s1401_s28  ;;  %p1409_p8 = scmp.lt.u32.totalorder %s1401_s28, %s1771_s19 }
 0x493   : > { %p1403_p1 = pnand %p1402_p0, %p1584_p5 }
 0x494   : > { %p1408_p7 = por %p1407_p4, %p1406_p3 }
 0x495   : > { %p1404_p2 = pneg %p1403_p1 }
 0x496   : > { %p1410_p9 = por %p1409_p8, %p1408_p7 }
 0x498   : > { %p1411_p10 = pnand %p1410_p9, %p1404_p2 }
 0x49a   : > { %1414 = shalt.err (!%p1411_p10)
}
 0x49b   : > { %1250 = dma.vmem_to_hbm [thread:$0]  (%p1584_p5), %s1765_s21, 256, %s1771_s19, %s1736_s1, %s1466_s25, %s1466_s25, %s1857_s11  }
 0x49c PF: > { %p1264_p11 = scmp.ge.s32.totalorder %s1453_s16, 2  ;;  %s1034_s22 = sand.u32 1, %s1441_s29  }
 0x49d   : > { %s1035_s27 = scalar_lea.sflag [#allocation3], %s1034_s22 }
 0x49e   : > { %p1255_p12 = pnand %p1264_p11, %p1588_p6 }
 0x4a0   : > { %1432 = dma.done.wait (!%p1255_p12), %s1035_s27, 256  }
 0x4a1   : > { %1434 = vsyncadd (!%p1255_p12), %s1035_s27, 4294967040  ;;  %s1859_s23 = sadd.s32 4294967294, %s1453_s16  }
 0x4a2   : > { %s1043_s0 = sand.u32 1, %s1859_s23  }
 0x4a3   : > { %s1044_s18 = scalar_lea.sflag [#allocation5], %s1043_s0 }
 0x4a4   : > { %1436 = dma.done.wait (!%p1255_p12), %s1044_s18, 512  }
 0x4a5   : > { %1438 = vsyncadd (!%p1255_p12), %s1044_s18, 4294966784  ;;  %s1860_s16 = sld [smem:[#allocation10_spill]]  ;;  %s1861_s1 = sld [smem:[#allocation9_spill]] }
 0x4a6   : > { %s1862_s15 = sld [smem:[#allocation11_spill]]  ;;  %s1863_s29 = smov %s1445_s30 }
 0x4ab   : > { %p28_p5 = scmp.ge.s32.totalorder %s1860_s16, 4   ;;  %s1864_s30 = smov %s1861_s1 }
 0x4ad   :  { %30 = sbr.rel (!%p28_p5) target bundleno = 11 (0xb), region = 148 }
 0x4b4   :  { %1058 = vsyncpa [#allocation3], 1 }
 0x4b5   :  { %1060 = vsyncpa [#allocation3 + $0x1], 1 }
 0x4b6   :  { %1061 = vsyncpa [#allocation5], 1 }
 0x4b7   :  { %1063 = vsyncpa [#allocation5 + $0x1], 1 }

</bundles_post_ra>
